<compile_context>
chip_gen: v5e
topology: v5e:2x2
jax: 0.10.0
libtpu: 0.0.40
codegen_flags: <defaults>
</compile_context>

<pallas_src>
import jax
import jax.numpy as jnp
from jax.experimental import pallas as pl
from jax.experimental.pallas import tpu as pltpu

D_IN = 28 * 28   # 784
HID = 32
N_CLASSES = 10
C_PAD = 128      # lane-dense compute width (classes live in the first 10 lanes)


def linear_net_kernel(x_ref, w1_ref, b1_ref, w2_ref, b2_ref, o_ref):
    # x_ref:  (TB, 784)  f32  -> cast to bf16 here (no wrapper-side cast pass)
    # w1_ref: (784, 32)  bf16    b1_ref: (1, 32)   f32
    # w2_ref: (32, 128)  bf16    b2_ref: (1, 128)  f32 (padded cols = -1e30)
    # o_ref:  (TB, 10)   f32
    x = x_ref[...].astype(jnp.bfloat16)

    # linear1 (bf16 MXU inputs, f32 accumulate) + bias + ReLU in f32
    h = jnp.dot(x, w1_ref[...], preferred_element_type=jnp.float32) + b1_ref[...]
    h = jnp.maximum(h, 0.0)

    # linear2 (bf16 MXU inputs, f32 accumulate) + bias in f32.
    # Padded output columns get logit ~ -1e30 -> exp underflows to exactly 0,
    # so they never perturb the max or the softmax denominator.
    logits = jnp.dot(h.astype(jnp.bfloat16), w2_ref[...],
                     preferred_element_type=jnp.float32) + b2_ref[...]

    # numerically stable softmax over the (lane-dense padded) class dim
    m = jnp.max(logits, axis=1, keepdims=True)
    e = jnp.exp(logits - m)
    denom = jnp.sum(e, axis=1, keepdims=True)
    probs = e * pl.reciprocal(denom, approx=False)

    # store only the 10 real classes (lane-masked store; negligible vs DMA time)
    o_ref[...] = probs[:, :N_CLASSES].astype(o_ref.dtype)


def _round_up(n, m):
    return -(-n // m) * m


def prepare_params(w1, b1, w2, b2):
    """Cast / pad the weights once (hoisted out of the per-call path)."""
    w1_bf = w1.astype(jnp.bfloat16)                                   # (784, 32)
    b1_2d = b1.reshape(1, HID).astype(jnp.float32)                    # (1, 32)
    # Pad classes 10 -> 128 so the matmul + softmax reductions stay lane-dense.
    # Zero weights + -1e30 bias => padded classes contribute exactly 0.
    w2_pad = jnp.zeros((HID, C_PAD), jnp.bfloat16)
    w2_pad = w2_pad.at[:, :N_CLASSES].set(w2.astype(jnp.bfloat16))    # (32, 128)
    b2_pad = jnp.full((1, C_PAD), -1e30, jnp.float32)
    b2_pad = b2_pad.at[:, :N_CLASSES].set(b2.astype(jnp.float32))     # (1, 128)
    return w1_bf, b1_2d, w2_pad, b2_pad


def linear_net_forward(x_nchw, params, *, tb=1024):
    """x_nchw: (B, 1, 28, 28) f32 -> (B, 10) softmax probabilities (f32).

    tb=1024 fits the v5e 16 MiB scoped-VMEM default with f32 x double-buffered;
    on v6e/v7x you can pass tb=2048/4096 and the scoped limit is raised
    automatically below.
    """
    w1_bf, b1_2d, w2_pad, b2_pad = params
    B = x_nchw.shape[0]
    # Same row-major flatten as torch.nn.Flatten (metadata-only reshape).
    x_flat = x_nchw.reshape(B, -1)
    assert x_flat.shape[1] == D_IN

    # Batch tile: multiple of 8 (f32 sublane), capped by tb.
    TB = min(tb, _round_up(B, 8))
    grid = (pl.cdiv(B, TB),)

    # VMEM estimate: double-buffered f32 x tiles dominate. Only raise the
    # scoped limit when a large tb actually needs it.
    est_vmem = (2 * TB * D_IN * x_flat.dtype.itemsize          # x, 2 buffers
                + 2 * TB * N_CLASSES * 4                       # out, 2 buffers
                + (D_IN * HID + HID * C_PAD) * 2               # bf16 weights
                + (HID + C_PAD) * 4)                           # f32 biases
    vmem_limit = None
    if est_vmem > 12 * 1024 * 1024:
        vmem_limit = min(int(est_vmem * 3 // 2), 60 * 1024 * 1024)

    out = pl.pallas_call(
        linear_net_kernel,
        out_shape=jax.ShapeDtypeStruct((B, N_CLASSES), jnp.float32),
        grid=grid,
        in_specs=[
            pl.BlockSpec((TB, D_IN), lambda i: (i, 0)),    # x: streamed per tile
            pl.BlockSpec((D_IN, HID), lambda i: (0, 0)),   # w1: resident
            pl.BlockSpec((1, HID), lambda i: (0, 0)),      # b1: resident
            pl.BlockSpec((HID, C_PAD), lambda i: (0, 0)),  # w2: resident
            pl.BlockSpec((1, C_PAD), lambda i: (0, 0)),    # b2: resident
        ],
        # (TB, 10): last dim equals the full array dim -> legal; stores the
        # 10 real classes directly, no padded writeback / wrapper slice pass.
        out_specs=pl.BlockSpec((TB, N_CLASSES), lambda i: (i, 0)),
        compiler_params=pltpu.CompilerParams(
            dimension_semantics=("parallel",),
            vmem_limit_bytes=vmem_limit,
        ),
    )(x_flat, w1_bf, b1_2d, w2_pad, b2_pad)

    return out


def init_params(key):
    """Deterministic init matching torch.nn.Linear's U(-1/sqrt(fan_in), 1/sqrt(fan_in))."""
    k1, k2, k3, k4 = jax.random.split(key, 4)
    bound1 = 1.0 / jnp.sqrt(D_IN)
    bound2 = 1.0 / jnp.sqrt(HID)
    w1 = jax.random.uniform(k1, (D_IN, HID), jnp.float32, -bound1, bound1)
    b1 = jax.random.uniform(k2, (HID,), jnp.float32, -bound1, bound1)
    w2 = jax.random.uniform(k3, (HID, N_CLASSES), jnp.float32, -bound2, bound2)
    b2 = jax.random.uniform(k4, (N_CLASSES,), jnp.float32, -bound2, bound2)
    return w1, b1, w2, b2


def _reference(x_nchw, w1, b1, w2, b2):
    """Pure-JAX reference with matching bf16 matmul inputs / f32 accumulation."""
    xb = x_nchw.reshape(x_nchw.shape[0], -1).astype(jnp.bfloat16)
    h = jnp.dot(xb, w1.astype(jnp.bfloat16),
                preferred_element_type=jnp.float32) + b1
    h = jnp.maximum(h, 0.0)
    logits = jnp.dot(h.astype(jnp.bfloat16), w2.astype(jnp.bfloat16),
                     preferred_element_type=jnp.float32) + b2
    return jax.nn.softmax(logits, axis=1)


if __name__ == "__main__":
    key = jax.random.PRNGKey(0)
    k_params, k_x1, k_x2 = jax.random.split(key, 3)
    w1, b1, w2, b2 = init_params(k_params)
    params = prepare_params(w1, b1, w2, b2)   # cast/pad once, reused per call

    # Small MNIST-shaped batch (B, 1, 28, 28), NCHW.
    B = 2
    x = jax.random.normal(k_x1, (B, 1, 28, 28), jnp.float32)

    out = linear_net_forward(x, params)
    out = jax.block_until_ready(out)

    ref = _reference(x, w1, b1, w2, b2)
    assert out.shape == (B, N_CLASSES)
    assert jnp.allclose(out, ref, atol=1e-2, rtol=1e-1)
    assert jnp.allclose(jnp.sum(out, axis=1), 1.0, atol=5e-3)

    # Exercise the multi-step batch grid (full tile + partial last tile).
    B2 = 1040
    x2 = jax.random.normal(k_x2, (B2, 1, 28, 28), jnp.float32)
    out2 = jax.block_until_ready(linear_net_forward(x2, params))
    ref2 = _reference(x2, w1, b1, w2, b2)
    assert out2.shape == (B2, N_CLASSES)
    assert jnp.allclose(out2, ref2, atol=1e-2, rtol=1e-1)
    assert jnp.allclose(jnp.sum(out2, axis=1), 1.0, atol=5e-3)

    print("KERNEL_OK")
</pallas_src>

<mosaic_0001>
module attributes {stable_mosaic.version = 11 : i64} {
  func.func @linear_net_kernel(%arg0: i32, %arg1: memref<8x784xf32, #tpu.memory_space<vmem>>, %arg2: memref<784x32xbf16, #tpu.memory_space<vmem>>, %arg3: memref<1x32xf32, #tpu.memory_space<vmem>>, %arg4: memref<32x128xbf16, #tpu.memory_space<vmem>>, %arg5: memref<1x128xf32, #tpu.memory_space<vmem>>, %arg6: memref<8x10xf32, #tpu.memory_space<vmem>>) attributes {dimension_semantics = [#tpu.dimension_semantics<parallel>], iteration_bounds = array<i64: 1>, scalar_prefetch = 0 : i64, scratch_operands = 0 : i64, tpu.core_type = #tpu.core_type<tc>, window_params = [{transform_indices = @transform_0, window_bounds = array<i64: 8, 784>}, {pipeline_mode = #tpu.pipeline_mode<synchronous>, transform_indices = @transform_1, window_bounds = array<i64: 784, 32>}, {pipeline_mode = #tpu.pipeline_mode<synchronous>, transform_indices = @transform_2, window_bounds = array<i64: 1, 32>}, {pipeline_mode = #tpu.pipeline_mode<synchronous>, transform_indices = @transform_3, window_bounds = array<i64: 32, 128>}, {pipeline_mode = #tpu.pipeline_mode<synchronous>, transform_indices = @transform_4, window_bounds = array<i64: 1, 128>}, {transform_indices = @transform_5, window_bounds = array<i64: 8, 10>}]} {
    %c0 = arith.constant 0 : index
    %c0_0 = arith.constant 0 : index
    %0 = vector.load %arg1[%c0, %c0_0] : memref<8x784xf32, #tpu.memory_space<vmem>>, vector<8x784xf32>
    %1 = arith.truncf %0 : vector<8x784xf32> to vector<8x784xbf16>
    %c0_1 = arith.constant 0 : index
    %c0_2 = arith.constant 0 : index
    %2 = vector.load %arg2[%c0_1, %c0_2] : memref<784x32xbf16, #tpu.memory_space<vmem>>, vector<784x32xbf16>
    %cst = arith.constant dense<0.000000e+00> : vector<8x32xf32>
    %3 = tpu.matmul %1, %2, %cst {dimension_numbers = #tpu.dot_dimension_numbers<[1], [0], [0], [1], [0, 0, 1, 1], [], []>} : vector<8x784xbf16>, vector<784x32xbf16>, vector<8x32xf32> -> vector<8x32xf32>
    %c0_3 = arith.constant 0 : index
    %c0_4 = arith.constant 0 : index
    %4 = vector.load %arg3[%c0_3, %c0_4] : memref<1x32xf32, #tpu.memory_space<vmem>>, vector<1x32xf32>
    %5 = vector.broadcast %4 : vector<1x32xf32> to vector<8x32xf32>
    %6 = arith.addf %3, %5 : vector<8x32xf32>
    %cst_5 = arith.constant 0.000000e+00 : f32
    %7 = vector.broadcast %cst_5 : f32 to vector<8x32xf32>
    %8 = arith.maximumf %6, %7 : vector<8x32xf32>
    %9 = arith.truncf %8 : vector<8x32xf32> to vector<8x32xbf16>
    %c0_6 = arith.constant 0 : index
    %c0_7 = arith.constant 0 : index
    %10 = vector.load %arg4[%c0_6, %c0_7] : memref<32x128xbf16, #tpu.memory_space<vmem>>, vector<32x128xbf16>
    %cst_8 = arith.constant dense<0.000000e+00> : vector<8x128xf32>
    %11 = tpu.matmul %9, %10, %cst_8 {dimension_numbers = #tpu.dot_dimension_numbers<[1], [0], [0], [1], [0, 0, 1, 1], [], []>} : vector<8x32xbf16>, vector<32x128xbf16>, vector<8x128xf32> -> vector<8x128xf32>
    %c0_9 = arith.constant 0 : index
    %c0_10 = arith.constant 0 : index
    %12 = vector.load %arg5[%c0_9, %c0_10] : memref<1x128xf32, #tpu.memory_space<vmem>>, vector<1x128xf32>
    %13 = vector.broadcast %12 : vector<1x128xf32> to vector<8x128xf32>
    %14 = arith.addf %11, %13 : vector<8x128xf32>
    %cst_11 = arith.constant dense<0xFF800000> : vector<8xf32>
    %15 = vector.multi_reduction <maximumf>, %14, %cst_11 [1] : vector<8x128xf32> to vector<8xf32>
    %16 = vector.shape_cast %15 : vector<8xf32> to vector<8x1xf32>
    %17 = vector.broadcast %16 : vector<8x1xf32> to vector<8x128xf32>
    %18 = arith.subf %14, %17 : vector<8x128xf32>
    %19 = math.exp %18 : vector<8x128xf32>
    %cst_12 = arith.constant dense<0.000000e+00> : vector<8xf32>
    %20 = vector.multi_reduction <add>, %19, %cst_12 [1] : vector<8x128xf32> to vector<8xf32>
    %21 = vector.shape_cast %20 : vector<8xf32> to vector<8x1xf32>
    %22 = tpu.reciprocal %21 : vector<8x1xf32> -> vector<8x1xf32>
    %23 = vector.broadcast %22 : vector<8x1xf32> to vector<8x128xf32>
    %24 = arith.mulf %19, %23 : vector<8x128xf32>
    %25 = vector.extract_strided_slice %24 {offsets = [0, 0], sizes = [8, 10], strides = [1, 1]} : vector<8x128xf32> to vector<8x10xf32>
    %c0_13 = arith.constant 0 : index
    %c0_14 = arith.constant 0 : index
    %26 = vector.load %arg6[%c0_13, %c0_14] : memref<8x10xf32, #tpu.memory_space<vmem>>, vector<8x10xf32>
    tpu.vector_store %arg6[%c0_13, %c0_14], %25 {strides = array<i32>} : memref<8x10xf32, #tpu.memory_space<vmem>>, vector<8x10xf32>,
    return
  }
  func.func @transform_0(%arg0: i32) -> (i32, i32) {
    %c0_i32 = arith.constant 0 : i32
    %c0_i32_0 = arith.constant 0 : i32
    return %arg0, %c0_i32 : i32, i32
  }
  func.func @transform_1(%arg0: i32) -> (i32, i32) {
    %c0_i32 = arith.constant 0 : i32
    %c0_i32_0 = arith.constant 0 : i32
    %c0_i32_1 = arith.constant 0 : i32
    return %c0_i32, %c0_i32_0 : i32, i32
  }
  func.func @transform_2(%arg0: i32) -> (i32, i32) {
    %c0_i32 = arith.constant 0 : i32
    %c0_i32_0 = arith.constant 0 : i32
    %c0_i32_1 = arith.constant 0 : i32
    return %c0_i32, %c0_i32_0 : i32, i32
  }
  func.func @transform_3(%arg0: i32) -> (i32, i32) {
    %c0_i32 = arith.constant 0 : i32
    %c0_i32_0 = arith.constant 0 : i32
    %c0_i32_1 = arith.constant 0 : i32
    return %c0_i32, %c0_i32_0 : i32, i32
  }
  func.func @transform_4(%arg0: i32) -> (i32, i32) {
    %c0_i32 = arith.constant 0 : i32
    %c0_i32_0 = arith.constant 0 : i32
    %c0_i32_1 = arith.constant 0 : i32
    return %c0_i32, %c0_i32_0 : i32, i32
  }
  func.func @transform_5(%arg0: i32) -> (i32, i32) {
    %c0_i32 = arith.constant 0 : i32
    %c0_i32_0 = arith.constant 0 : i32
    return %arg0, %c0_i32 : i32, i32
  }
}

</mosaic_0001>

<bundles_post_ra>
// kernel: tpu_custom_call.1
= control target key start
LH: loop header
LB: loop body
LE: loop exit
PB: predicated region body
PF: predicated region fallthrough
CT: control target
= control target key end

     0   :  { %10 = vsyncpa [#allocation3], 0  ;;  %vm470_vm0 = vcmask 130048   ;;  %vm587_vm1 = vcmask 261120   ;;  %vm626_vm6 = vcmask 80896   ;;  %s1157_s0 = inlined_call_operand.vmem [shape: f32[2,784], index: 0, kind: input, shape index: {}]   ;;  %s1158_s1 = inlined_call_operand.vmem [shape: bf16[784,32], index: 1, kind: input, shape index: {}]   ;;  %s1159_s2 = inlined_call_operand.vmem [shape: f32[1,32], index: 2, kind: input, shape index: {}]   ;;  %s1160_s3 = inlined_call_operand.vmem [shape: bf16[32,128], index: 3, kind: input, shape index: {}]   ;;  %s1161_s4 = inlined_call_operand.vmem [shape: f32[1,128], index: 4, kind: input, shape index: {}]   ;;  %s1162_s5 = inlined_call_operand.hbm [shape: f32[2,10], index: 5, kind: output, shape index: {}]  }
   0x1   :  { %v859_v0 = vld [vmem:[%s1158_s1 + $0x38] sm:$0xff]  ;;  %v858_v3 = vld [vmem:[%s1158_s1 + $0x30] sm:$0xff]  ;;  %v857_v7 = vld [vmem:[%s1158_s1 + $0x28] sm:$0xff] }
   0x2   :  { %v867_v1 = vld [vmem:[%s1158_s1 + $0x78] sm:$0xff]  ;;  %474 = vmatpush.bf16.msra.mxu0 %v859_v0  ;;  %v866_v4 = vld [vmem:[%s1158_s1 + $0x70] sm:$0xff]  ;;  %v865_v8 = vld [vmem:[%s1158_s1 + $0x68] sm:$0xff] }
   0x3   :  { %v875_v2 = vld [vmem:[%s1158_s1 + $0xb8] sm:$0xff]  ;;  %487 = vmatpush.bf16.msra.mxu1 %v867_v1  ;;  %v874_v5 = vld [vmem:[%s1158_s1 + $0xb0] sm:$0xff]  ;;  %v873_v9 = vld [vmem:[%s1158_s1 + $0xa8] sm:$0xff] }
   0x4   :  { %500 = vmatpush.bf16.msra.mxu2 %v875_v2  ;;  %v883_v6 = vld [vmem:[%s1158_s1 + $0xf8] sm:$0xff]  ;;  %v882_v10 = vld [vmem:[%s1158_s1 + $0xf0] sm:$0xff]  ;;  %v856_v11 = vld [vmem:[%s1158_s1 + $0x20] sm:$0xff] }
   0x5   :  { %513 = vmatpush.bf16.msra.mxu3 %v883_v6  ;;  %v864_v12 = vld [vmem:[%s1158_s1 + $0x60] sm:$0xff]  ;;  %v881_v14 = vld [vmem:[%s1158_s1 + $0xe8] sm:$0xff]  ;;  %v855_v19 = vld [vmem:[%s1158_s1 + $0x18] sm:$0xff] }
   0x6   :  { %475 = vmatpush.bf16.msra.mxu0 %v858_v3  ;;  %v872_v13 = vld [vmem:[%s1158_s1 + $0xa0] sm:$0xff]  ;;  %v24_v16 = vld [vmem:[%s1157_s0 + $0xe] sm:$0xff]  ;;  %v863_v20 = vld [vmem:[%s1158_s1 + $0x58] sm:$0xff] }
   0x7   :  { %488 = vmatpush.bf16.msra.mxu1 %v866_v4  ;;  %v22_v15 = vld [vmem:[%s1157_s0] sm:$0xff]  ;;  %v28_v18 = vld [vmem:[%s1157_s0 + $0x2a] sm:$0xff]  ;;  %40 = vst [vmem:[#allocation1 + $0x1] ss:$4 sm:$0xff] %v24_v16  ;;  %v871_v21 = vld [vmem:[%s1158_s1 + $0x98] sm:$0xff] }
   0x8   :  { %501 = vmatpush.bf16.msra.mxu2 %v874_v5  ;;  %v26_v17 = vld [vmem:[%s1157_s0 + $0x1c] sm:$0xff]  ;;  %38 = vst [vmem:[#allocation1] ss:$4 sm:$0xff] %v22_v15  ;;  %v854_v23 = vld [vmem:[%s1158_s1 + $0x10] sm:$0xff]  ;;  %v23_v24 = vld [vmem:[%s1157_s0 + $0x8] sm:$0x3f] }
   0x9   :  { %514 = vmatpush.bf16.msra.mxu3 %v882_v10  ;;  %42 = vst [vmem:[#allocation1 + $0x2] ss:$4 sm:$0xff] %v26_v17  ;;  %v880_v22 = vld [vmem:[%s1158_s1 + $0xe0] sm:$0xff]  ;;  %v25_v25 = vld [vmem:[%s1157_s0 + $0x16] sm:$0x3f]  ;;  %v853_v31 = vld [vmem:[%s1158_s1 + $0x8] sm:$0xff] }
   0xa   :  { %476 = vmatpush.bf16.msra.mxu0 %v857_v7  ;;  %44 = vst [vmem:[#allocation1 + $0x3] ss:$4 sm:$0xff] %v28_v18  ;;  %v862_v26 = vld [vmem:[%s1158_s1 + $0x50] sm:$0xff]  ;;  %v27_v27 = vld [vmem:[%s1157_s0 + $0x24] sm:$0x3f]  ;;  %v879_v30 = vld [vmem:[%s1158_s1 + $0xd8] sm:$0xff] }
   0xb   :  { %489 = vmatpush.bf16.msra.mxu1 %v865_v8  ;;  %v29_v28 = vld [vmem:[%s1157_s0 + $0x32] sm:$0x3f]  ;;  %46 = vst [vmem:[#allocation1 + $0x20] ss:$4 sm:$0xff] %v23_v24  ;;  %v861_v32 = vld [vmem:[%s1158_s1 + $0x48] sm:$0xff]  ;;  %v852_v35 = vld [vmem:[%s1158_s1] sm:$0xff] }
   0xc   :  { %502 = vmatpush.bf16.msra.mxu2 %v873_v9  ;;  %v870_v29 = vld [vmem:[%s1158_s1 + $0x90] sm:$0xff]  ;;  %48 = vst [vmem:[#allocation1 + $0x21] ss:$4 sm:$0xff] %v25_v25  ;;  %v869_v33 = vld [vmem:[%s1158_s1 + $0x88] sm:$0xff]  ;;  %v860_v36 = vld [vmem:[%s1158_s1 + $0x40] sm:$0xff] }
   0xd   :  { %515 = vmatpush.bf16.msra.mxu3 %v881_v14  ;;  %50 = vst [vmem:[#allocation1 + $0x22] ss:$4 sm:$0xff] %v27_v27  ;;  %v878_v34 = vld [vmem:[%s1158_s1 + $0xd0] sm:$0xff]  ;;  %v891_v39 = vld [vmem:[%s1158_s1 + $0x138] sm:$0xff]  ;;  %v868_v41 = vld [vmem:[%s1158_s1 + $0x80] sm:$0xff] }
   0xe   :  { %477 = vmatpush.bf16.msra.mxu0 %v856_v11  ;;  %52 = vst [vmem:[#allocation1 + $0x23] ss:$4 sm:$0xff] %v29_v28  ;;  %v899_v40 = vld [vmem:[%s1158_s1 + $0x178] sm:$0xff]  ;;  %v877_v42 = vld [vmem:[%s1158_s1 + $0xc8] sm:$0xff]  ;;  %v900_v46 = vld [vmem:[%s1158_s1 + $0x180] sm:$0xff] }
   0xf   :  { %490 = vmatpush.bf16.msra.mxu1 %v864_v12  ;;  %v890_v47 = vld [vmem:[%s1158_s1 + $0x130] sm:$0xff]  ;;  %v876_v50 = vld [vmem:[%s1158_s1 + $0xc0] sm:$0xff]  ;;  %v889_v52 = vld [vmem:[%s1158_s1 + $0x128] sm:$0xff] }
  0x10   :  { %503 = vmatpush.bf16.msra.mxu2 %v872_v13  ;;  %v898_v48 = vld [vmem:[%s1158_s1 + $0x170] sm:$0xff]  ;;  %v897_v53 = vld [vmem:[%s1158_s1 + $0x168] sm:$0xff]  ;;  %v888_v55 = vld [vmem:[%s1158_s1 + $0x120] sm:$0xff] }
  0x11   :  { %516 = vmatpush.bf16.msra.mxu3 %v880_v22  ;;  %v53_v37 = vld.sshfl [vmem:[#allocation1] sm:$0xff pattern:$0x73625140]  ;;  %v54_v38 = vld.sshfl [vmem:[#allocation1 + $0x8] sm:$0xff pattern:$0x73625140] }
  0x12   :  { %478 = vmatpush.bf16.msra.mxu0 %v855_v19  ;;  %v55_v43 = vld.sshfl [vmem:[#allocation1 + $0x10] sm:$0xff pattern:$0x73625140]  ;;  %v67_v44 = vpack.c.bf16 %v53_v37, %v53_v37  ;;  %v68_v45 = vpack.c.bf16 %v54_v38, %v54_v38  ;;  %v56_v51 = vld.sshfl [vmem:[#allocation1 + $0x18] sm:$0xff pattern:$0x73625140] }
  0x13   :  { %491 = vmatpush.bf16.msra.mxu1 %v863_v20  ;;  %v69_v49 = vpack.c.bf16 %v55_v43, %v55_v43  ;;  %v70_v54 = vpack.c.bf16 %v56_v51, %v56_v51  ;;  %v896_v56 = vld [vmem:[%s1158_s1 + $0x160] sm:$0xff]  ;;  %v887_v57 = vld [vmem:[%s1158_s1 + $0x118] sm:$0xff]  ;;  %v886_v60 = vld [vmem:[%s1158_s1 + $0x110] sm:$0xff] }
  0x14   :  { %504 = vmatpush.bf16.msra.mxu2 %v871_v21  ;;  %v895_v58 = vld [vmem:[%s1158_s1 + $0x158] sm:$0xff]  ;;  %v894_v61 = vld [vmem:[%s1158_s1 + $0x150] sm:$0xff]  ;;  %v885_v63 = vld [vmem:[%s1158_s1 + $0x108] sm:$0xff] }
  0x15   :  { %517 = vmatpush.bf16.msra.mxu3 %v879_v30  ;;  %v59_v59 = vld.sshfl [vmem:[#allocation1 + $0x30] sm:$0xff pattern:$0x73625140]  ;;  %v893_v0 = vld [vmem:[%s1158_s1 + $0x148] sm:$0xff]  ;;  %v884_v1 = vld [vmem:[%s1158_s1 + $0x100] sm:$0xff] }
  0x16   :  { %479 = vmatpush.bf16.msra.mxu0 %v854_v23  ;;  %v73_v62 = vpack.c.bf16 %v59_v59, %v59_v59  ;;  %v892_v2 = vld [vmem:[%s1158_s1 + $0x140] sm:$0xff]  ;;  %v58_v4 = vld.sshfl [vmem:[#allocation1 + $0x28] sm:$0xff pattern:$0x73625140] }
  0x17   :  { %492 = vmatpush.bf16.msra.mxu1 %v862_v26  ;;  %v57_v3 = vld.sshfl [vmem:[#allocation1 + $0x20] sm:$0xff pattern:$0x73625140]  ;;  %v72_v6 = vpack.c.bf16 %v58_v4, %v58_v4  ;;  %v902_v7 = vld [vmem:[%s1160_s3 + $0x8] sm:$0xff] }
  0x18   :  { %505 = vmatpush.bf16.msra.mxu2 %v870_v29  ;;  %v71_v5 = vpack.c.bf16 %v57_v3, %v57_v3  ;;  %v901_v10 = vld [vmem:[%s1160_s3] sm:$0xff] }
  0x19   :  { %518 = vmatpush.bf16.msra.mxu3 %v878_v34  ;;  %v906_v14 = vld [vmem:[%s1159_s2] ss:$0 sm:$0xff] }
  0x1a   :  { %480 = vmatpush.bf16.msra.mxu0 %v853_v31 }
  0x1b   :  { %493 = vmatpush.bf16.msra.mxu1 %v861_v32 }
  0x1c   :  { %506 = vmatpush.bf16.msra.mxu2 %v869_v33  ;;  %v907_v33 = vld [vmem:[%s1161_s4] ss:$0 sm:$0xff] }
  0x1d   :  { %519 = vmatpush.bf16.msra.mxu3 %v877_v42 }
  0x1e   :  { %481 = vmatpush.bf16.msra.mxu0 %v852_v35 }
  0x1f   :  { %494 = vmatpush.bf16.msra.mxu1 %v860_v36 }
  0x20   :  { %507 = vmatpush.bf16.msra.mxu2 %v868_v41 }
  0x21   :  { %482 = vmatmul.bf16.vlgmr.msra.gmra.mxu0 %v67_v44  ;;  %520 = vmatpush.bf16.msra.mxu3 %v876_v50 }
  0x22   :  { %526 = vmatpush.bf16.msrb.mxu0 %v891_v39  ;;  %495 = vmatmul.bf16.vlgmr.msra.gmra.mxu1 %v68_v45 }
  0x23   :  { %539 = vmatpush.bf16.msrb.mxu1 %v899_v40  ;;  %508 = vmatmul.bf16.vlgmr.msra.gmra.mxu2 %v69_v49 }
  0x24   :  { %559 = vmatpush.bf16.msrb.mxu2 %v900_v46  ;;  %521 = vmatmul.bf16.vlgmr.msra.gmra.mxu3 %v70_v54 }
  0x25   :  { %597 = vmatpush.bf16.msrb.mxu3 %v902_v7 }
  0x26   :  { %527 = vmatpush.bf16.msrb.mxu0 %v890_v47 }
  0x27   :  { %540 = vmatpush.bf16.msrb.mxu1 %v898_v48 }
  0x29   :  { %598 = vmatpush.bf16.msrb.mxu3 %v901_v10 }
  0x2a   :  { %528 = vmatpush.bf16.msrb.mxu0 %v889_v52 }
  0x2b   :  { %541 = vmatpush.bf16.msrb.mxu1 %v897_v53 }
  0x2e   :  { %529 = vmatpush.bf16.msrb.mxu0 %v888_v55 }
  0x2f   :  { %542 = vmatpush.bf16.msrb.mxu1 %v896_v56 }
  0x32   :  { %530 = vmatpush.bf16.msrb.mxu0 %v887_v57 }
  0x33   :  { %543 = vmatpush.bf16.msrb.mxu1 %v895_v58  ;;  %842 = vmatmul.msk.bf16.vlgmr.msrb.gmra.mxu2 %vm470_vm0, %v73_v62 }
  0x36   :  { %531 = vmatpush.bf16.msrb.mxu0 %v886_v60 }
  0x37   :  { %544 = vmatpush.bf16.msrb.mxu1 %v894_v61 }
  0x3a   :  { %532 = vmatpush.bf16.msrb.mxu0 %v885_v63 }
  0x3b   :  { %545 = vmatpush.bf16.msrb.mxu1 %v893_v0 }
  0x3e   :  { %533 = vmatpush.bf16.msrb.mxu0 %v884_v1 }
  0x3f   :  { %546 = vmatpush.bf16.msrb.mxu1 %v892_v2 }
  0x41   :  { %534 = vmatmul.bf16.vlgmr.msrb.gmra.mxu0 %v71_v5 }
  0x42   :  { %547 = vmatmul.bf16.vlgmr.msrb.gmra.mxu1 %v72_v6 }
  0x9e   :  { %v483_v8 = vpop.f32.mrf.mxu0 }
  0x9f   :  { %v496_v9 = vpop.f32.mrf.mxu1  ;;  %v484_v16 = vadd.f32 %v906_v14, %v483_v8 }
  0xa1   :  { %v497_v18 = vadd.f32 %v496_v9, %v484_v16 }
  0xa6   :  { %v485_v11 = vpop.f32.mrf.mxu0  ;;  %v509_v13 = vpop.f32.mrf.mxu2 }
  0xa7   :  { %v498_v12 = vpop.f32.mrf.mxu1  ;;  %v522_v15 = vpop.f32.mrf.mxu3  ;;  %v510_v20 = vadd.f32 %v509_v13, %v497_v18 }
  0xa9   :  { %v523_v22 = vadd.f32 %v522_v15, %v510_v20 }
  0xae   :  { %v511_v17 = vpop.f32.mrf.mxu2 }
  0xaf   :  { %v524_v19 = vpop.f32.mrf.mxu3 }
  0xb6   :  { %v561_v21 = vpop.f32.mrf.mxu2 }
  0xbe   :  { %v535_v23 = vpop.f32.mrf.mxu0  ;;  %v563_v27 = vpop.f32.mrf.mxu2 }
  0xbf   :  { %v548_v24 = vpop.f32.mrf.mxu1  ;;  %v536_v25 = vadd.f32 %v535_v23, %v523_v22 }
  0xc1   :  { %v549_v26 = vadd.f32 %v548_v24, %v536_v25 }
  0xc3   :  { %v562_v28 = vadd.f32 %v561_v21, %v549_v26 }
  0xc5   :  { %v565_v29 = vmax.f32 %v562_v28, 0.0 }
  0xc6   :  { %v537_v30 = vpop.f32.mrf.mxu0 }
  0xc7   :  { %v550_v31 = vpop.f32.mrf.mxu1  ;;  %v566_v32 = vpack.c.bf16 %v565_v29, %v565_v29 }
  0xc9   :  { %851 = vmatmul.msk.bf16.vlgmr.msrb.gmra.mxu3 %vm587_vm1, %v566_v32 }
 0x14c   :  { %v600_v34 = vpop.f32.mrf.mxu3 }
 0x14d   :  { %v601_v35 = vadd.f32 %v907_v33, %v600_v34 }
 0x14f   :  { %604 = vmax.xlane.f32.xlu0 %v601_v35 }
 0x154   :  { %v602_v36 = vpop.f32.mrf.mxu3 }
 0x1c2   :  { %v605_v37 = vpop.xlane.xlu0 %604 }
 0x1c3   :  { %v606_v38 = vsub.f32 %v601_v35, %v605_v37 }
 0x1c5   :  { %v607_v39 = vmul.f32 1.442695, %v606_v38 }
 0x1c7   :  { %908 = vpow2.f32 %v607_v39 }
 0x1cd   :  { %v909_v40 = vpop.eup %908 }
 0x1ce   :  { %609 = vadd.xlane.f32.xlu0 %v909_v40 }
 0x241   :  { %v610_v41 = vpop.xlane.xlu0 %609 }
 0x242   :  { %910 = vrcp.f32 %v610_v41  ;;  %v622_v45 = vand.u32 2147483648, %v610_v41  ;;  %v620_v47 = vand.u32 2147483647, %v610_v41  ;;  %vm616_vm3 = vweird.f32 %v610_v41 }
 0x244   :  { %v623_v49 = vor.u32 1.1754944e-38, %v622_v45  ;;  %vm621_vm5 = vcmp.eq.f32.partialorder %v620_v47, 8.507059e+37 }
 0x248   :  { %v911_v42 = vpop.eup %910 }
 0x249   :  { %v612_v43 = vmul.f32 %v911_v42, %v610_v41  ;;  %vm617_vm2 = vweird.f32 %v911_v42 }
 0x24a   :  { %vm618_vm4 = vmor %vm616_vm3, %vm617_vm2 }
 0x24b   :  { %v613_v44 = vsub.f32 1.0, %v612_v43 }
 0x24d   :  { %v614_v46 = vmul.f32 %v911_v42, %v613_v44 }
 0x24f   :  { %v615_v48 = vadd.f32 %v911_v42, %v614_v46 }
 0x251   :  { %v619_v50 = vsel %vm618_vm4, %v911_v42, %v615_v48 }
 0x252   :  { %v624_v51 = vsel %vm621_vm5, %v623_v49, %v619_v50 }
 0x253   :  { %v625_v52 = vmul.f32 %v909_v40, %v624_v51 }
 0x255   :  { %627 = vst.msk [vmem:[#allocation2] sm:$0xff] %vm626_vm6, %v625_v52 }
 0x256   :  { %631 = vsyncadd [#allocation3], 96  ;;  %s634_s10 = sshll.u32 %s1162_s5, 4  ;;  %s938_s11 = smov [#allocation2]   ;;  %s635_s10 = int_to_ptr.hbm [resolvable:$true] %s634_s10 }
 0x257   :  { %s632_s12 = sshll.u32 %s938_s11, 4  ;;  %s939_s13 = smov 32   ;;  %s633_s12 = int_to_ptr.vmem [resolvable:$true] %s632_s12 }
 0x258   :  { %s940_s14 = smov 2  }
 0x259   :  { %640 = dma.vmem_to_hbm [thread:$0]  %s633_s12, 32, %s635_s10, [#allocation3], %s939_s13, %s939_s13, %s940_s14  }
 0x25a   :  { %936 = dma.done.wait [#allocation3], 128  }
 0x25b   :  { %937 = vsyncadd [#allocation3], 4294967168 }
 0x25c   :  { %645 = vsyncpa [#allocation3], 1 }

</bundles_post_ra>
